<compile_context>
chip_gen: v5e
topology: v5e:2x2
jax: 0.10.0
libtpu: 0.0.40
codegen_flags: <defaults>
</compile_context>

<pallas_src>
import jax
import jax.numpy as jnp
from jax.experimental import pallas as pl
from jax.experimental.pallas import tpu as pltpu


def _causal_encoder_kernel(x_ref, w1f_ref, b1_ref, w2_ref, b2_ref,
                           wnx_ref, wnh_ref, bn_ref, z_ref):
    x = x_ref[...]                                    # (TN, d_in)

    # edge MLP with the causal prior folded into the first weight:
    #   h = ReLU(X @ W1_fused + b1) ; He = ReLU(h @ W2 + b2)
    h = jnp.dot(x, w1f_ref[...], preferred_element_type=jnp.float32) + b1_ref[...]
    h = jnp.maximum(h, 0.0)
    h = jnp.dot(h, w2_ref[...], preferred_element_type=jnp.float32) + b2_ref[...]
    he = jnp.maximum(h, 0.0)

    # node MLP: cat([X, He]) @ Wn folded into two split matmuls
    z = (jnp.dot(x, wnx_ref[...], preferred_element_type=jnp.float32)
         + jnp.dot(he, wnh_ref[...], preferred_element_type=jnp.float32)
         + bn_ref[...])
    z_ref[...] = jnp.maximum(z, 0.0)                  # (TN, dh_pad), lane-dense


def causal_encoder(X, A, params, *, tile_n=1024):
    """X: (N, d_in) f32. A: (d_in, d_in) f32. params: weights stored as (in, out)."""
    N, d_in = X.shape
    d_hid = params["b1"].shape[-1]

    # ---- host-side algebraic fold + lane padding (all exact, zero-padded) -------
    dh = ((d_hid + 127) // 128) * 128                 # lane-dense hidden width

    w1 = params["w1"]                                 # (2*d_in, d_hid)
    w1_fused = A.T @ w1[:d_in] + A @ w1[d_in:]        # (d_in, d_hid), exact fold

    pad_c = lambda w: jnp.pad(w, ((0, 0), (0, dh - d_hid)))
    pad_b = lambda b: jnp.pad(b.reshape(1, -1), ((0, 0), (0, dh - d_hid)))
    pad_rc = lambda w: jnp.pad(w, ((0, dh - d_hid), (0, dh - d_hid)))

    w1f = pad_c(w1_fused)                             # (d_in, dh)
    b1 = pad_b(params["b1"])                          # (1, dh)
    w2 = pad_rc(params["w2"])                         # (dh, dh)
    b2 = pad_b(params["b2"])
    wn = params["wn"]                                 # (d_in + d_hid, d_hid)
    wnx = pad_c(wn[:d_in])                            # (d_in, dh)
    wnh = pad_rc(wn[d_in:])                           # (dh, dh)
    bn = pad_b(params["bn"])

    # ---- row tiling: large tiles, arbitrary N via zero row-padding --------------
    tn = min(tile_n, N)
    tn = max(8, ((tn + 7) // 8) * 8)                  # sublane multiple
    n_pad = pl.cdiv(N, tn) * tn
    Xp = jnp.pad(X, ((0, n_pad - N), (0, 0))) if n_pad != N else X

    full = lambda shape: pl.BlockSpec(shape, lambda i: (0, 0))

    z_pad = pl.pallas_call(
        _causal_encoder_kernel,
        out_shape=jax.ShapeDtypeStruct((n_pad, dh), jnp.float32),
        grid_spec=pltpu.PrefetchScalarGridSpec(
            num_scalar_prefetch=0,
            grid=(n_pad // tn,),
            in_specs=[
                pl.BlockSpec((tn, d_in), lambda i: (i, 0)),   # X tile
                full((d_in, dh)), full((1, dh)),              # fused edge Linear1
                full((dh, dh)),   full((1, dh)),              # edge Linear2
                full((d_in, dh)), full((dh, dh)), full((1, dh)),  # node Linear (split)
            ],
            out_specs=pl.BlockSpec((tn, dh), lambda i: (i, 0)),
        ),
        compiler_params=pltpu.CompilerParams(
            dimension_semantics=("parallel",)),
    )(Xp, w1f, b1, w2, b2, wnx, wnh, bn)

    return z_pad[:N, :d_hid]


def causal_encoder_ref(X, A, params):
    """Pure-JAX reference mirroring the PyTorch forward exactly."""
    send = X @ A.T
    recv = X @ A
    e = jnp.concatenate([send, recv], axis=-1)
    h = jnp.maximum(e @ params["w1"] + params["b1"], 0.0)
    he = jnp.maximum(h @ params["w2"] + params["b2"], 0.0)
    n = jnp.concatenate([X, he], axis=-1)
    return jnp.maximum(n @ params["wn"] + params["bn"], 0.0)


def init_params(key, d_in, d_hid):
    """Deterministic parameter init. Weights stored as (in, out) == PyTorch weight.T."""
    ks = jax.random.split(key, 6)
    s1 = 1.0 / jnp.sqrt(2.0 * d_in)
    s2 = 1.0 / jnp.sqrt(1.0 * d_hid)
    s3 = 1.0 / jnp.sqrt(1.0 * (d_in + d_hid))
    return {
        "w1": jax.random.uniform(ks[0], (2 * d_in, d_hid), jnp.float32, -s1, s1),
        "b1": jax.random.uniform(ks[1], (d_hid,), jnp.float32, -s1, s1),
        "w2": jax.random.uniform(ks[2], (d_hid, d_hid), jnp.float32, -s2, s2),
        "b2": jax.random.uniform(ks[3], (d_hid,), jnp.float32, -s2, s2),
        "wn": jax.random.uniform(ks[4], (d_in + d_hid, d_hid), jnp.float32, -s3, s3),
        "bn": jax.random.uniform(ks[5], (d_hid,), jnp.float32, -s3, s3),
    }


if __name__ == "__main__":
    d_in, d_hid = 16, 32
    N = 64

    key = jax.random.PRNGKey(0)
    kx, ka, kp = jax.random.split(key, 3)

    X = jax.random.normal(kx, (N, d_in), jnp.float32)
    # A_prior buffer: deterministic "causal prior" adjacency-like matrix.
    A = (jax.random.uniform(ka, (d_in, d_in), jnp.float32) > 0.7).astype(jnp.float32)
    params = init_params(kp, d_in, d_hid)

    Z = causal_encoder(X, A, params)
    Z = jax.block_until_ready(Z)

    Z_ref = causal_encoder_ref(X, A, params)
    assert Z.shape == (N, d_hid)
    assert jnp.allclose(Z, Z_ref, atol=1e-5, rtol=1e-5), "mismatch vs reference"

    print("KERNEL_OK")
</pallas_src>

<mosaic_0001>
module attributes {stable_mosaic.version = 11 : i64} {
  func.func @_causal_encoder_kernel(%arg0: i32, %arg1: memref<64x16xf32, #tpu.memory_space<vmem>>, %arg2: memref<16x128xf32, #tpu.memory_space<vmem>>, %arg3: memref<1x128xf32, #tpu.memory_space<vmem>>, %arg4: memref<128x128xf32, #tpu.memory_space<vmem>>, %arg5: memref<1x128xf32, #tpu.memory_space<vmem>>, %arg6: memref<16x128xf32, #tpu.memory_space<vmem>>, %arg7: memref<128x128xf32, #tpu.memory_space<vmem>>, %arg8: memref<1x128xf32, #tpu.memory_space<vmem>>, %arg9: memref<64x128xf32, #tpu.memory_space<vmem>>) attributes {dimension_semantics = [#tpu.dimension_semantics<parallel>], iteration_bounds = array<i64: 1>, scalar_prefetch = 0 : i64, scratch_operands = 0 : i64, tpu.core_type = #tpu.core_type<tc>, window_params = [{transform_indices = @transform_0, window_bounds = array<i64: 64, 16>}, {pipeline_mode = #tpu.pipeline_mode<synchronous>, transform_indices = @transform_1, window_bounds = array<i64: 16, 128>}, {pipeline_mode = #tpu.pipeline_mode<synchronous>, transform_indices = @transform_2, window_bounds = array<i64: 1, 128>}, {pipeline_mode = #tpu.pipeline_mode<synchronous>, transform_indices = @transform_3, window_bounds = array<i64: 128, 128>}, {pipeline_mode = #tpu.pipeline_mode<synchronous>, transform_indices = @transform_4, window_bounds = array<i64: 1, 128>}, {pipeline_mode = #tpu.pipeline_mode<synchronous>, transform_indices = @transform_5, window_bounds = array<i64: 16, 128>}, {pipeline_mode = #tpu.pipeline_mode<synchronous>, transform_indices = @transform_6, window_bounds = array<i64: 128, 128>}, {pipeline_mode = #tpu.pipeline_mode<synchronous>, transform_indices = @transform_7, window_bounds = array<i64: 1, 128>}, {transform_indices = @transform_8, window_bounds = array<i64: 64, 128>}]} {
    %c0 = arith.constant 0 : index
    %c0_0 = arith.constant 0 : index
    %0 = vector.load %arg1[%c0, %c0_0] : memref<64x16xf32, #tpu.memory_space<vmem>>, vector<64x16xf32>
    %c0_1 = arith.constant 0 : index
    %c0_2 = arith.constant 0 : index
    %1 = vector.load %arg2[%c0_1, %c0_2] : memref<16x128xf32, #tpu.memory_space<vmem>>, vector<16x128xf32>
    %cst = arith.constant dense<0.000000e+00> : vector<64x128xf32>
    %2 = tpu.matmul %0, %1, %cst {dimension_numbers = #tpu.dot_dimension_numbers<[1], [0], [0], [1], [0, 0, 1, 1], [], []>} : vector<64x16xf32>, vector<16x128xf32>, vector<64x128xf32> -> vector<64x128xf32>
    %c0_3 = arith.constant 0 : index
    %c0_4 = arith.constant 0 : index
    %3 = vector.load %arg3[%c0_3, %c0_4] : memref<1x128xf32, #tpu.memory_space<vmem>>, vector<1x128xf32>
    %4 = vector.broadcast %3 : vector<1x128xf32> to vector<64x128xf32>
    %5 = arith.addf %2, %4 : vector<64x128xf32>
    %cst_5 = arith.constant 0.000000e+00 : f32
    %6 = vector.broadcast %cst_5 : f32 to vector<64x128xf32>
    %7 = arith.maximumf %5, %6 : vector<64x128xf32>
    %c0_6 = arith.constant 0 : index
    %c0_7 = arith.constant 0 : index
    %8 = vector.load %arg4[%c0_6, %c0_7] : memref<128x128xf32, #tpu.memory_space<vmem>>, vector<128x128xf32>
    %cst_8 = arith.constant dense<0.000000e+00> : vector<64x128xf32>
    %9 = tpu.matmul %7, %8, %cst_8 {dimension_numbers = #tpu.dot_dimension_numbers<[1], [0], [0], [1], [0, 0, 1, 1], [], []>} : vector<64x128xf32>, vector<128x128xf32>, vector<64x128xf32> -> vector<64x128xf32>
    %c0_9 = arith.constant 0 : index
    %c0_10 = arith.constant 0 : index
    %10 = vector.load %arg5[%c0_9, %c0_10] : memref<1x128xf32, #tpu.memory_space<vmem>>, vector<1x128xf32>
    %11 = vector.broadcast %10 : vector<1x128xf32> to vector<64x128xf32>
    %12 = arith.addf %9, %11 : vector<64x128xf32>
    %cst_11 = arith.constant 0.000000e+00 : f32
    %13 = vector.broadcast %cst_11 : f32 to vector<64x128xf32>
    %14 = arith.maximumf %12, %13 : vector<64x128xf32>
    %c0_12 = arith.constant 0 : index
    %c0_13 = arith.constant 0 : index
    %15 = vector.load %arg6[%c0_12, %c0_13] : memref<16x128xf32, #tpu.memory_space<vmem>>, vector<16x128xf32>
    %cst_14 = arith.constant dense<0.000000e+00> : vector<64x128xf32>
    %16 = tpu.matmul %0, %15, %cst_14 {dimension_numbers = #tpu.dot_dimension_numbers<[1], [0], [0], [1], [0, 0, 1, 1], [], []>} : vector<64x16xf32>, vector<16x128xf32>, vector<64x128xf32> -> vector<64x128xf32>
    %c0_15 = arith.constant 0 : index
    %c0_16 = arith.constant 0 : index
    %17 = vector.load %arg7[%c0_15, %c0_16] : memref<128x128xf32, #tpu.memory_space<vmem>>, vector<128x128xf32>
    %cst_17 = arith.constant dense<0.000000e+00> : vector<64x128xf32>
    %18 = tpu.matmul %14, %17, %cst_17 {dimension_numbers = #tpu.dot_dimension_numbers<[1], [0], [0], [1], [0, 0, 1, 1], [], []>} : vector<64x128xf32>, vector<128x128xf32>, vector<64x128xf32> -> vector<64x128xf32>
    %19 = arith.addf %16, %18 : vector<64x128xf32>
    %c0_18 = arith.constant 0 : index
    %c0_19 = arith.constant 0 : index
    %20 = vector.load %arg8[%c0_18, %c0_19] : memref<1x128xf32, #tpu.memory_space<vmem>>, vector<1x128xf32>
    %21 = vector.broadcast %20 : vector<1x128xf32> to vector<64x128xf32>
    %22 = arith.addf %19, %21 : vector<64x128xf32>
    %cst_20 = arith.constant 0.000000e+00 : f32
    %23 = vector.broadcast %cst_20 : f32 to vector<64x128xf32>
    %24 = arith.maximumf %22, %23 : vector<64x128xf32>
    %c0_21 = arith.constant 0 : index
    %c0_22 = arith.constant 0 : index
    %25 = vector.load %arg9[%c0_21, %c0_22] : memref<64x128xf32, #tpu.memory_space<vmem>>, vector<64x128xf32>
    tpu.vector_store %arg9[%c0_21, %c0_22], %24 {strides = array<i32>} : memref<64x128xf32, #tpu.memory_space<vmem>>, vector<64x128xf32>,
    return
  }
  func.func @transform_0(%arg0: i32) -> (i32, i32) {
    %c0_i32 = arith.constant 0 : i32
    %c0_i32_0 = arith.constant 0 : i32
    return %arg0, %c0_i32 : i32, i32
  }
  func.func @transform_1(%arg0: i32) -> (i32, i32) {
    %c0_i32 = arith.constant 0 : i32
    %c0_i32_0 = arith.constant 0 : i32
    %c0_i32_1 = arith.constant 0 : i32
    return %c0_i32, %c0_i32_0 : i32, i32
  }
  func.func @transform_2(%arg0: i32) -> (i32, i32) {
    %c0_i32 = arith.constant 0 : i32
    %c0_i32_0 = arith.constant 0 : i32
    %c0_i32_1 = arith.constant 0 : i32
    return %c0_i32, %c0_i32_0 : i32, i32
  }
  func.func @transform_3(%arg0: i32) -> (i32, i32) {
    %c0_i32 = arith.constant 0 : i32
    %c0_i32_0 = arith.constant 0 : i32
    %c0_i32_1 = arith.constant 0 : i32
    return %c0_i32, %c0_i32_0 : i32, i32
  }
  func.func @transform_4(%arg0: i32) -> (i32, i32) {
    %c0_i32 = arith.constant 0 : i32
    %c0_i32_0 = arith.constant 0 : i32
    %c0_i32_1 = arith.constant 0 : i32
    return %c0_i32, %c0_i32_0 : i32, i32
  }
  func.func @transform_5(%arg0: i32) -> (i32, i32) {
    %c0_i32 = arith.constant 0 : i32
    %c0_i32_0 = arith.constant 0 : i32
    %c0_i32_1 = arith.constant 0 : i32
    return %c0_i32, %c0_i32_0 : i32, i32
  }
  func.func @transform_6(%arg0: i32) -> (i32, i32) {
    %c0_i32 = arith.constant 0 : i32
    %c0_i32_0 = arith.constant 0 : i32
    %c0_i32_1 = arith.constant 0 : i32
    return %c0_i32, %c0_i32_0 : i32, i32
  }
  func.func @transform_7(%arg0: i32) -> (i32, i32) {
    %c0_i32 = arith.constant 0 : i32
    %c0_i32_0 = arith.constant 0 : i32
    %c0_i32_1 = arith.constant 0 : i32
    return %c0_i32, %c0_i32_0 : i32, i32
  }
  func.func @transform_8(%arg0: i32) -> (i32, i32) {
    %c0_i32 = arith.constant 0 : i32
    %c0_i32_0 = arith.constant 0 : i32
    return %arg0, %c0_i32 : i32, i32
  }
}

</mosaic_0001>

<bundles_post_ra>
// kernel: tpu_custom_call.1
= control target key start
LH: loop header
LB: loop body
LE: loop exit
PB: predicated region body
PF: predicated region fallthrough
CT: control target
= control target key end

     0   :  { %13 = vsyncpa [#allocation3], 0  ;;  %s646_s0 = inlined_call_operand.vmem [shape: f32[64,16], index: 0, kind: input, shape index: {}]   ;;  %s647_s1 = inlined_call_operand.vmem [shape: f32[16,128], index: 1, kind: input, shape index: {}]   ;;  %s648_s2 = inlined_call_operand.vmem [shape: f32[1,128], index: 2, kind: input, shape index: {}]   ;;  %s649_s3 = inlined_call_operand.hbm [shape: f32[128,128], index: 3, kind: input, shape index: {}]   ;;  %s650_s4 = inlined_call_operand.vmem [shape: f32[1,128], index: 4, kind: input, shape index: {}]   ;;  %s651_s5 = inlined_call_operand.vmem [shape: f32[16,128], index: 5, kind: input, shape index: {}]   ;;  %s652_s6 = inlined_call_operand.hbm [shape: f32[128,128], index: 6, kind: input, shape index: {}]   ;;  %s653_s7 = inlined_call_operand.vmem [shape: f32[1,128], index: 7, kind: input, shape index: {}]   ;;  %s654_s8 = inlined_call_operand.hbm [shape: f32[64,128], index: 8, kind: output, shape index: {}]  }
   0x1   :  { %14 = vsyncpa [#allocation6], 0 }
   0x2   :  { %15 = vsyncpa [#allocation4], 0  ;;  %s26_s29 = sshll.u32 %s649_s3, 4  ;;  %s485_s30 = smov [#allocation2]   ;;  %s27_s29 = int_to_ptr.hbm [resolvable:$true] %s26_s29 }
   0x3   :  { %s28_s9 = sshll.u32 %s485_s30, 4  ;;  %s43_s12 = sshll.u32 %s652_s6, 4  ;;  %s29_s9 = int_to_ptr.vmem [resolvable:$true] %s28_s9  ;;  %s44_s12 = int_to_ptr.hbm [resolvable:$true] %s43_s12 }
   0x4   :  { %s486_s13 = smov 128   ;;  %s487_s14 = smov 8  }
   0x5   :  { %34 = dma.hbm_to_vmem [thread:$0]  %s27_s29, 2048, %s29_s9, [#allocation3], %s486_s13, %s486_s13, %s487_s14  }
   0x6   :  { %s488_s15 = smov [#allocation5]  }
   0x7   :  { %s45_s16 = sshll.u32 %s488_s15, 4  ;;  %s46_s16 = int_to_ptr.vmem [resolvable:$true] %s45_s16 }
   0x8   :  { %51 = dma.hbm_to_vmem [thread:$0]  %s44_s12, 2048, %s46_s16, [#allocation6], %s486_s13, %s486_s13, %s487_s14  }
   0x9   :  { %479 = dma.done.wait [#allocation3], 2048  }
   0xa   :  { %480 = vsyncadd [#allocation3], 4294965248 }
   0xb   :  { %481 = dma.done.wait [#allocation6], 2048  }
   0xc   :  { %482 = vsyncadd [#allocation6], 4294965248  ;;  %v71_v0 = vld [vmem:[%s647_s1 + $0x8] sm:$0xff]  ;;  %v70_v1 = vld [vmem:[%s647_s1] sm:$0xff]  ;;  %vm76_vm0 = vcmask 130048   ;;  %s353_s21 = sshll.u32 %s654_s8, 4  ;;  %s354_s21 = int_to_ptr.hbm [resolvable:$true] %s353_s21 }
   0xd   :  { %115 = vmatpush.msra.mxu0 %v71_v0  ;;  %v556_v2 = vld [vmem:[%s646_s0] sm:$0xff]  ;;  %v563_v3 = vld [vmem:[%s646_s0 + $0x8] sm:$0xff]  ;;  %v570_v4 = vld [vmem:[%s646_s0 + $0x10] sm:$0xff] }
   0xe   :  { %v577_v5 = vld [vmem:[%s646_s0 + $0x18] sm:$0xff]  ;;  %v164_v7 = vld [vmem:[#allocation2 + $0x70] sm:$0xff]  ;;  %v163_v8 = vld [vmem:[#allocation2 + $0x68] sm:$0xff] }
   0xf   :  { %116 = vmatpush.msra.mxu0 %v70_v1  ;;  %v165_v6 = vld [vmem:[#allocation2 + $0x78] sm:$0xff]  ;;  %v162_v9 = vld [vmem:[#allocation2 + $0x60] sm:$0xff]  ;;  %v160_v12 = vld [vmem:[#allocation2 + $0x50] sm:$0xff] }
  0x10   :  { %367 = vmatmul.msk.f32.vlgmr.msra.gmra.mxu0 %vm76_vm0, %v556_v2  ;;  %383 = vmatpush.msra.mxu1 %v165_v6  ;;  %v584_v10 = vld [vmem:[%s646_s0 + $0x20] sm:$0xff]  ;;  %v161_v11 = vld [vmem:[#allocation2 + $0x58] sm:$0xff]  ;;  %v159_v13 = vld [vmem:[#allocation2 + $0x48] sm:$0xff] }
  0x11   :  { %170 = vmatpush.msrb.mxu0 %v165_v6  ;;  %v158_v14 = vld [vmem:[#allocation2 + $0x40] sm:$0xff]  ;;  %v591_v15 = vld [vmem:[%s646_s0 + $0x28] sm:$0xff]  ;;  %v157_v16 = vld [vmem:[#allocation2 + $0x38] sm:$0xff] }
  0x12   :  { %384 = vmatpush.msra.mxu1 %v164_v7  ;;  %v156_v17 = vld [vmem:[#allocation2 + $0x30] sm:$0xff]  ;;  %v155_v18 = vld [vmem:[#allocation2 + $0x28] sm:$0xff]  ;;  %v154_v19 = vld [vmem:[#allocation2 + $0x20] sm:$0xff] }
  0x13   :  { %171 = vmatpush.msrb.mxu0 %v164_v7  ;;  %v598_v20 = vld [vmem:[%s646_s0 + $0x30] sm:$0xff]  ;;  %v153_v21 = vld [vmem:[#allocation2 + $0x18] sm:$0xff]  ;;  %v151_v23 = vld [vmem:[#allocation2 + $0x8] sm:$0xff] }
  0x14   :  { %385 = vmatpush.msra.mxu1 %v163_v8  ;;  %v152_v22 = vld [vmem:[#allocation2 + $0x10] sm:$0xff]  ;;  %v605_v24 = vld [vmem:[%s646_s0 + $0x38] sm:$0xff]  ;;  %v150_v25 = vld [vmem:[#allocation2] sm:$0xff] }
  0x15   :  { %172 = vmatpush.msrb.mxu0 %v163_v8  ;;  %v404_v26 = vld [vmem:[%s648_s2] ss:$0 sm:$0xff]  ;;  %v236_v39 = vld [vmem:[#allocation5 + $0x78] sm:$0xff]  ;;  %v235_v40 = vld [vmem:[#allocation5 + $0x70] sm:$0xff] }
  0x16   :  { %386 = vmatpush.msra.mxu1 %v162_v9  ;;  %237 = vmatpush.msra.mxu2 %v236_v39  ;;  %v234_v41 = vld [vmem:[#allocation5 + $0x68] sm:$0xff]  ;;  %v233_v44 = vld [vmem:[#allocation5 + $0x60] sm:$0xff]  ;;  %v232_v46 = vld [vmem:[#allocation5 + $0x58] sm:$0xff] }
  0x17   :  { %173 = vmatpush.msrb.mxu0 %v162_v9  ;;  %v231_v47 = vld [vmem:[#allocation5 + $0x50] sm:$0xff]  ;;  %v230_v48 = vld [vmem:[#allocation5 + $0x48] sm:$0xff]  ;;  %v229_v51 = vld [vmem:[#allocation5 + $0x40] sm:$0xff] }
  0x18   :  { %368 = vmatmul.msk.f32.gmra.mxu0 %vm76_vm0, %v563_v3  ;;  %387 = vmatpush.msra.mxu1 %v161_v11  ;;  %v228_v53 = vld [vmem:[#allocation5 + $0x38] sm:$0xff]  ;;  %v227_v54 = vld [vmem:[#allocation5 + $0x30] sm:$0xff]  ;;  %v226_v55 = vld [vmem:[#allocation5 + $0x28] sm:$0xff] }
  0x19   :  { %174 = vmatpush.msrb.mxu0 %v161_v11  ;;  %238 = vmatpush.msra.mxu2 %v235_v40  ;;  %v225_v58 = vld [vmem:[#allocation5 + $0x20] sm:$0xff]  ;;  %v224_v60 = vld [vmem:[#allocation5 + $0x18] sm:$0xff]  ;;  %v223_v0 = vld [vmem:[#allocation5 + $0x10] sm:$0xff] }
  0x1a   :  { %388 = vmatpush.msra.mxu1 %v160_v12  ;;  %v222_v1 = vld [vmem:[#allocation5 + $0x8] sm:$0xff]  ;;  %v221_v7 = vld [vmem:[#allocation5] sm:$0xff] }
  0x1b   :  { %175 = vmatpush.msrb.mxu0 %v160_v12  ;;  %239 = vmatpush.msra.mxu2 %v234_v41  ;;  %v220_v6 = vld [vmem:[%s651_s5 + $0x8] sm:$0xff]  ;;  %v219_v8 = vld [vmem:[%s651_s5] sm:$0xff] }
  0x1c   :  { %389 = vmatpush.msra.mxu1 %v159_v13  ;;  %292 = vmatpush.msra.mxu3 %v220_v6  ;;  %v405_v9 = vld [vmem:[%s650_s4] ss:$0 sm:$0xff] }
  0x1d   :  { %176 = vmatpush.msrb.mxu0 %v159_v13  ;;  %240 = vmatpush.msra.mxu2 %v233_v44 }
  0x1e   :  { %390 = vmatpush.msra.mxu1 %v158_v14  ;;  %293 = vmatpush.msra.mxu3 %v219_v8 }
  0x1f   :  { %177 = vmatpush.msrb.mxu0 %v158_v14  ;;  %241 = vmatpush.msra.mxu2 %v232_v46 }
  0x20   :  { %369 = vmatmul.msk.f32.gmra.mxu0 %vm76_vm0, %v570_v4  ;;  %391 = vmatpush.msra.mxu1 %v157_v16 }
  0x21   :  { %178 = vmatpush.msrb.mxu0 %v157_v16  ;;  %242 = vmatpush.msra.mxu2 %v231_v47 }
  0x22   :  { %392 = vmatpush.msra.mxu1 %v156_v17  ;;  %375 = vmatmul.msk.f32.vlgmr.msra.gmra.mxu3 %vm76_vm0, %v556_v2 }
  0x23   :  { %179 = vmatpush.msrb.mxu0 %v156_v17  ;;  %243 = vmatpush.msra.mxu2 %v230_v48 }
  0x24   :  { %393 = vmatpush.msra.mxu1 %v155_v18 }
  0x25   :  { %180 = vmatpush.msrb.mxu0 %v155_v18  ;;  %244 = vmatpush.msra.mxu2 %v229_v51 }
  0x26   :  { %394 = vmatpush.msra.mxu1 %v154_v19 }
  0x27   :  { %181 = vmatpush.msrb.mxu0 %v154_v19  ;;  %245 = vmatpush.msra.mxu2 %v228_v53 }
  0x28   :  { %370 = vmatmul.msk.f32.gmra.mxu0 %vm76_vm0, %v577_v5  ;;  %395 = vmatpush.msra.mxu1 %v153_v21 }
  0x29   :  { %182 = vmatpush.msrb.mxu0 %v153_v21  ;;  %246 = vmatpush.msra.mxu2 %v227_v54 }
  0x2a   :  { %396 = vmatpush.msra.mxu1 %v152_v22  ;;  %376 = vmatmul.msk.f32.gmra.mxu3 %vm76_vm0, %v563_v3 }
  0x2b   :  { %183 = vmatpush.msrb.mxu0 %v152_v22  ;;  %247 = vmatpush.msra.mxu2 %v226_v55 }
  0x2c   :  { %397 = vmatpush.msra.mxu1 %v151_v23 }
  0x2d   :  { %184 = vmatpush.msrb.mxu0 %v151_v23  ;;  %248 = vmatpush.msra.mxu2 %v225_v58 }
  0x2e   :  { %398 = vmatpush.msra.mxu1 %v150_v25 }
  0x2f   :  { %185 = vmatpush.msrb.mxu0 %v150_v25  ;;  %249 = vmatpush.msra.mxu2 %v224_v60 }
  0x30   :  { %371 = vmatmul.msk.f32.gmra.mxu0 %vm76_vm0, %v584_v10 }
  0x31   :  { %250 = vmatpush.msra.mxu2 %v223_v0 }
  0x32   :  { %377 = vmatmul.msk.f32.gmra.mxu3 %vm76_vm0, %v570_v4 }
  0x33   :  { %251 = vmatpush.msra.mxu2 %v222_v1 }
  0x35   :  { %252 = vmatpush.msra.mxu2 %v221_v7 }
  0x38   :  { %372 = vmatmul.msk.f32.gmra.mxu0 %vm76_vm0, %v591_v15 }
  0x3a   :  { %378 = vmatmul.msk.f32.gmra.mxu3 %vm76_vm0, %v577_v5 }
  0x40   :  { %373 = vmatmul.msk.f32.gmra.mxu0 %vm76_vm0, %v598_v20 }
  0x42   :  { %379 = vmatmul.msk.f32.gmra.mxu3 %vm76_vm0, %v584_v10 }
  0x48   :  { %374 = vmatmul.msk.f32.gmra.mxu0 %vm76_vm0, %v605_v24 }
  0x4a   :  { %380 = vmatmul.msk.f32.gmra.mxu3 %vm76_vm0, %v591_v15 }
  0x52   :  { %381 = vmatmul.msk.f32.gmra.mxu3 %vm76_vm0, %v598_v20 }
  0x5a   :  { %382 = vmatmul.msk.f32.gmra.mxu3 %vm76_vm0, %v605_v24  ;;  %v406_v24 = vld [vmem:[%s653_s7] ss:$0 sm:$0xff]  ;;  %s489_s7 = smov [#allocation7]  }
  0x5b   :  { %s351_s18 = sshll.u32 %s489_s7, 4  ;;  %s352_s18 = int_to_ptr.vmem [resolvable:$true] %s351_s18 }
  0x8d   :  { %v118_v27 = vpop.f32.mrf.mxu0 }
  0x8e   :  { %v119_v28 = vadd.f32 %v404_v26, %v118_v27 }
  0x90   :  { %v142_v29 = vmax.f32 %v119_v28, 0.0 }
  0x92   :  { %186 = vmatmul.f32.vlgmr.msrb.gmra.mxu0 %v142_v29 }
  0x95   :  { %v121_v30 = vpop.f32.mrf.mxu0 }
  0x96   :  { %v122_v31 = vadd.f32 %v404_v26, %v121_v30 }
  0x98   :  { %v143_v32 = vmax.f32 %v122_v31, 0.0 }
  0x9a   :  { %189 = vmatmul.f32.vlgmr.msra.gmra.mxu1 %v143_v32 }
  0x9d   :  { %v124_v33 = vpop.f32.mrf.mxu0 }
  0x9e   :  { %v125_v34 = vadd.f32 %v404_v26, %v124_v33 }
  0xa0   :  { %v144_v35 = vmax.f32 %v125_v34, 0.0 }
  0xa2   :  { %192 = vmatmul.f32.gmra.mxu1 %v144_v35 }
  0xa5   :  { %v127_v36 = vpop.f32.mrf.mxu0  ;;  %v295_v31 = vpop.f32.mrf.mxu3 }
  0xa6   :  { %v128_v37 = vadd.f32 %v404_v26, %v127_v36 }
  0xa8   :  { %v145_v38 = vmax.f32 %v128_v37, 0.0 }
  0xaa   :  { %195 = vmatmul.f32.gmra.mxu1 %v145_v38 }
  0xad   :  { %v130_v42 = vpop.f32.mrf.mxu0  ;;  %v298_v32 = vpop.f32.mrf.mxu3 }
  0xae   :  { %v131_v43 = vadd.f32 %v404_v26, %v130_v42 }
  0xb0   :  { %v146_v45 = vmax.f32 %v131_v43, 0.0 }
  0xb2   :  { %198 = vmatmul.f32.gmra.mxu1 %v146_v45 }
  0xb5   :  { %v133_v49 = vpop.f32.mrf.mxu0  ;;  %v301_v36 = vpop.f32.mrf.mxu3 }
  0xb6   :  { %v134_v50 = vadd.f32 %v404_v26, %v133_v49 }
  0xb8   :  { %v147_v52 = vmax.f32 %v134_v50, 0.0 }
  0xba   :  { %201 = vmatmul.f32.gmra.mxu1 %v147_v52 }
  0xbd   :  { %v136_v56 = vpop.f32.mrf.mxu0  ;;  %v304_v42 = vpop.f32.mrf.mxu3 }
  0xbe   :  { %v137_v57 = vadd.f32 %v404_v26, %v136_v56 }
  0xc0   :  { %v148_v59 = vmax.f32 %v137_v57, 0.0 }
  0xc2   :  { %204 = vmatmul.f32.gmra.mxu1 %v148_v59 }
  0xc5   :  { %v139_v61 = vpop.f32.mrf.mxu0  ;;  %v307_v48 = vpop.f32.mrf.mxu3 }
  0xc6   :  { %v140_v62 = vadd.f32 %v404_v26, %v139_v61 }
  0xc8   :  { %v149_v63 = vmax.f32 %v140_v62, 0.0 }
  0xca   :  { %207 = vmatmul.f32.gmra.mxu1 %v149_v63 }
  0xcd   :  { %v310_v54 = vpop.f32.mrf.mxu3 }
  0xd5   :  { %v313_v60 = vpop.f32.mrf.mxu3 }
  0xdd   :  { %v316_v6 = vpop.f32.mrf.mxu3 }
 0x10f   :  { %v187_v11 = vpop.f32.mrf.mxu0 }
 0x110   :  { %v188_v12 = vadd.f32 %v405_v9, %v187_v11 }
 0x112   :  { %v211_v13 = vmax.f32 %v188_v12, 0.0 }
 0x114   :  { %253 = vmatmul.f32.vlgmr.msra.gmra.mxu2 %v211_v13 }
 0x117   :  { %v190_v2 = vpop.f32.mrf.mxu1 }
 0x118   :  { %v191_v14 = vadd.f32 %v405_v9, %v190_v2 }
 0x11a   :  { %v212_v3 = vmax.f32 %v191_v14, 0.0 }
 0x11c   :  { %256 = vmatmul.f32.gmra.mxu2 %v212_v3 }
 0x11f   :  { %v193_v4 = vpop.f32.mrf.mxu1 }
 0x120   :  { %v194_v16 = vadd.f32 %v405_v9, %v193_v4 }
 0x122   :  { %v213_v17 = vmax.f32 %v194_v16, 0.0 }
 0x124   :  { %259 = vmatmul.f32.gmra.mxu2 %v213_v17 }
 0x127   :  { %v196_v5 = vpop.f32.mrf.mxu1 }
 0x128   :  { %v197_v18 = vadd.f32 %v405_v9, %v196_v5 }
 0x12a   :  { %v214_v19 = vmax.f32 %v197_v18, 0.0 }
 0x12c   :  { %262 = vmatmul.f32.gmra.mxu2 %v214_v19 }
 0x12f   :  { %v199_v10 = vpop.f32.mrf.mxu1 }
 0x130   :  { %v200_v21 = vadd.f32 %v405_v9, %v199_v10 }
 0x132   :  { %v215_v22 = vmax.f32 %v200_v21, 0.0 }
 0x134   :  { %265 = vmatmul.f32.gmra.mxu2 %v215_v22 }
 0x137   :  { %v202_v23 = vpop.f32.mrf.mxu1 }
 0x138   :  { %v203_v15 = vadd.f32 %v405_v9, %v202_v23 }
 0x13a   :  { %v216_v25 = vmax.f32 %v203_v15, 0.0 }
 0x13c   :  { %268 = vmatmul.f32.gmra.mxu2 %v216_v25 }
 0x13f   :  { %v205_v26 = vpop.f32.mrf.mxu1 }
 0x140   :  { %v206_v27 = vadd.f32 %v405_v9, %v205_v26 }
 0x142   :  { %v217_v28 = vmax.f32 %v206_v27, 0.0 }
 0x144   :  { %271 = vmatmul.f32.gmra.mxu2 %v217_v28 }
 0x147   :  { %v208_v20 = vpop.f32.mrf.mxu1 }
 0x148   :  { %v209_v29 = vadd.f32 %v405_v9, %v208_v20 }
 0x14a   :  { %v218_v30 = vmax.f32 %v209_v29, 0.0 }
 0x14c   :  { %274 = vmatmul.f32.gmra.mxu2 %v218_v30 }
 0x197   :  { %v254_v33 = vpop.f32.mrf.mxu2 }
 0x198   :  { %v296_v34 = vadd.f32 %v295_v31, %v254_v33 }
 0x19a   :  { %v323_v35 = vadd.f32 %v406_v24, %v296_v34 }
 0x19c   :  { %v331_v37 = vmax.f32 %v323_v35, 0.0 }
 0x19e   :  { %339 = vst [vmem:[#allocation7] sm:$0xff] %v331_v37 }
 0x19f   :  { %v257_v38 = vpop.f32.mrf.mxu2 }
 0x1a0   :  { %v299_v39 = vadd.f32 %v298_v32, %v257_v38 }
 0x1a2   :  { %v324_v40 = vadd.f32 %v406_v24, %v299_v39 }
 0x1a4   :  { %v332_v41 = vmax.f32 %v324_v40, 0.0 }
 0x1a6   :  { %340 = vst [vmem:[#allocation7 + $0x8] sm:$0xff] %v332_v41 }
 0x1a7   :  { %v260_v43 = vpop.f32.mrf.mxu2 }
 0x1a8   :  { %v302_v44 = vadd.f32 %v301_v36, %v260_v43 }
 0x1aa   :  { %v325_v45 = vadd.f32 %v406_v24, %v302_v44 }
 0x1ac   :  { %v333_v46 = vmax.f32 %v325_v45, 0.0 }
 0x1ae   :  { %341 = vst [vmem:[#allocation7 + $0x10] sm:$0xff] %v333_v46 }
 0x1af   :  { %v263_v47 = vpop.f32.mrf.mxu2 }
 0x1b0   :  { %v305_v49 = vadd.f32 %v304_v42, %v263_v47 }
 0x1b2   :  { %v326_v50 = vadd.f32 %v406_v24, %v305_v49 }
 0x1b4   :  { %v334_v51 = vmax.f32 %v326_v50, 0.0 }
 0x1b6   :  { %342 = vst [vmem:[#allocation7 + $0x18] sm:$0xff] %v334_v51 }
 0x1b7   :  { %v266_v52 = vpop.f32.mrf.mxu2 }
 0x1b8   :  { %v308_v53 = vadd.f32 %v307_v48, %v266_v52 }
 0x1ba   :  { %v327_v55 = vadd.f32 %v406_v24, %v308_v53 }
 0x1bc   :  { %v335_v56 = vmax.f32 %v327_v55, 0.0 }
 0x1be   :  { %343 = vst [vmem:[#allocation7 + $0x20] sm:$0xff] %v335_v56 }
 0x1bf   :  { %v269_v57 = vpop.f32.mrf.mxu2 }
 0x1c0   :  { %v311_v58 = vadd.f32 %v310_v54, %v269_v57 }
 0x1c2   :  { %v328_v59 = vadd.f32 %v406_v24, %v311_v58 }
 0x1c4   :  { %v336_v61 = vmax.f32 %v328_v59, 0.0 }
 0x1c6   :  { %344 = vst [vmem:[#allocation7 + $0x28] sm:$0xff] %v336_v61 }
 0x1c7   :  { %v272_v62 = vpop.f32.mrf.mxu2 }
 0x1c8   :  { %v314_v63 = vadd.f32 %v313_v60, %v272_v62 }
 0x1ca   :  { %v329_v0 = vadd.f32 %v406_v24, %v314_v63 }
 0x1cc   :  { %v337_v1 = vmax.f32 %v329_v0, 0.0 }
 0x1ce   :  { %345 = vst [vmem:[#allocation7 + $0x30] sm:$0xff] %v337_v1 }
 0x1cf   :  { %v275_v7 = vpop.f32.mrf.mxu2 }
 0x1d0   :  { %v317_v8 = vadd.f32 %v316_v6, %v275_v7 }
 0x1d2   :  { %v330_v9 = vadd.f32 %v406_v24, %v317_v8 }
 0x1d4   :  { %v338_v11 = vmax.f32 %v330_v9, 0.0 }
 0x1d6   :  { %346 = vst [vmem:[#allocation7 + $0x38] sm:$0xff] %v338_v11 }
 0x1d7   :  { %359 = dma.vmem_to_hbm [thread:$0]  %s352_s18, 1024, %s354_s21, [#allocation4], %s486_s13, %s486_s13, %s487_s14  }
 0x1d8   :  { %483 = dma.done.wait [#allocation4], 1024  }
 0x1d9   :  { %484 = vsyncadd [#allocation4], 4294966272 }
 0x1da   :  { %364 = vsyncpa [#allocation3], 1 }
 0x1db   :  { %365 = vsyncpa [#allocation6], 1 }
 0x1dc   :  { %366 = vsyncpa [#allocation4], 1 }

</bundles_post_ra>
